<compile_context>
chip_gen: v7x
topology: tpu7x:2x2x1
jax: 0.10.0
libtpu: 0.0.40
codegen_flags: <defaults>
</compile_context>

<pallas_src>
import functools

import jax
import jax.numpy as jnp
from jax.experimental import pallas as pl
from jax.experimental.pallas import tpu as pltpu


def _round_up(x, m):
    return ((x + m - 1) // m) * m


def _decoder_kernel(mode, idx_ref, vf_ref, *refs):
    """refs = (w1, b1, w2, b2, ..., wn, bn, out_ref).

    idx_ref block: (tile_h, K) int32  -- hyperedge member indices (streamed)
    vf_ref  block: (N_pad, D) f32     -- node features, VMEM-resident
    """
    out_ref = refs[-1]
    param_refs = refs[:-1]
    n_layers = len(param_refs) // 2

    vf = vf_ref[...]                         # (N_pad, D) f32, resident
    idx = idx_ref[...]                       # (TH, K)   int32
    th, k_deg = idx.shape
    n_pad = vf.shape[0]

    # Hoisted once (JAX does not CSE broadcasts inside the unrolled loop).
    node_iota = jax.lax.broadcasted_iota(jnp.int32, (th, n_pad), 1)

    def gather(k):
        # Exact row gather via one-hot selector on the MXU:
        #   out[i, :] = vf[idx[i, k], :]
        onehot = (idx[:, k:k + 1] == node_iota).astype(jnp.float32)      # (TH, N_pad)
        return jnp.dot(onehot, vf, preferred_element_type=jnp.float32)   # (TH, D)

    # aggregate(embeddings, mode) over the K hyperedge members: short unrolled
    # loop with running reductions (no K-wide intermediate).
    x0 = gather(0)
    if mode == "Maxmin":
        mx = x0
        mn = x0
        for k in range(1, k_deg):
            x = gather(k)
            mx = jnp.maximum(mx, x)
            mn = jnp.minimum(mn, x)
        h = mx - mn                          # (TH, D)
    elif mode == "Avg":
        h = x0
        for k in range(1, k_deg):
            h = h + gather(k)
        # the 1/K of the mean is folded into W1 in the wrapper
    else:
        raise ValueError(f"unknown mode {mode}")

    # classifier: Linear (+ReLU except last), then sigmoid
    for li in range(n_layers):
        w = param_refs[2 * li][...]          # (in, out) f32
        b = param_refs[2 * li + 1][...]      # (1, out)  f32
        h = jnp.dot(h, w, preferred_element_type=jnp.float32) + b
        if li != n_layers - 1:
            h = jnp.maximum(h, 0.0)
    out_ref[...] = jax.nn.sigmoid(h).astype(out_ref.dtype)   # (TH, out_dim)


def decoder_forward(v_feat, hedge_idx, params, mode, *, tile_h=2048):
    """v_feat: (N, D) f32; hedge_idx: (H, K) int32;
    params: list of (W(in,out), b(out,)) == PyTorch (weight.T, bias)."""
    if mode not in ("Maxmin", "Avg"):
        raise ValueError(f"unknown mode {mode}")
    N, D = v_feat.shape
    H, K = hedge_idx.shape
    out_dim = params[-1][0].shape[1]

    # Node table: pad rows to a sublane multiple (indices never hit the pad),
    # keep f32, stays fully VMEM-resident inside the kernel.
    N_pad = _round_up(max(N, 8), 8)
    vf = v_feat.astype(jnp.float32)
    if N_pad != N:
        vf = jnp.pad(vf, ((0, N_pad - N), (0, 0)))

    # Tile over hyperedges; pad H with index-0 rows (sliced off afterwards).
    th = _round_up(min(tile_h, _round_up(H, 8)), 8)
    H_pad = _round_up(H, th)
    idx = hedge_idx.astype(jnp.int32)
    if H_pad != H:
        idx = jnp.concatenate(
            [idx, jnp.zeros((H_pad - H, K), jnp.int32)], axis=0)

    in_specs = [
        pl.BlockSpec((th, K), lambda i: (i, 0)),       # member indices (streamed)
        pl.BlockSpec((N_pad, D), lambda i: (0, 0)),    # node features (resident)
    ]
    flat_params = []
    for li, (w, b) in enumerate(params):
        w = w.astype(jnp.float32)
        b = b.astype(jnp.float32)
        if li == 0 and mode == "Avg":
            w = w / K                                  # fold mean's 1/K into W1
        b2 = b.reshape(1, -1)
        in_specs.append(pl.BlockSpec(w.shape, lambda i: (0, 0)))   # VMEM-resident
        in_specs.append(pl.BlockSpec(b2.shape, lambda i: (0, 0)))
        flat_params += [w, b2]

    kernel = functools.partial(_decoder_kernel, mode)
    out = pl.pallas_call(
        kernel,
        out_shape=jax.ShapeDtypeStruct((H_pad, out_dim), jnp.float32),
        grid=(H_pad // th,),
        in_specs=in_specs,
        out_specs=pl.BlockSpec((th, out_dim), lambda i: (i, 0)),
        compiler_params=pltpu.CompilerParams(
            dimension_semantics=("parallel",)),
    )(idx, vf, *flat_params)
    return out[:H]


def _reference(v_feat, hedge_idx, params, mode):
    emb = v_feat[hedge_idx]                                   # (H, K, D)
    if mode == "Maxmin":
        agg = jnp.max(emb, axis=1) - jnp.min(emb, axis=1)
    else:
        agg = jnp.mean(emb, axis=1)
    h = agg
    for li, (w, b) in enumerate(params):
        h = jnp.dot(h, w, precision=jax.lax.Precision.HIGHEST) + b
        if li != len(params) - 1:
            h = jnp.maximum(h, 0.0)
    return jax.nn.sigmoid(h)


if __name__ == "__main__":
    # Decoder(layers=[32, 64, 16, 8]): Linear(32,64)+ReLU, Linear(64,16)+ReLU, Linear(16,8)
    layers = [32, 64, 16, 8]
    N, D = 16, layers[0]   # 16 nodes, feature dim 32
    H, K = 20, 4           # 20 hyperedges (exercises H padding), degree 4

    key = jax.random.PRNGKey(0)
    k_feat, k_idx, k_p = jax.random.split(key, 3)

    v_feat = jax.random.normal(k_feat, (N, D), dtype=jnp.float32)
    hedge_idx = jax.random.randint(k_idx, (H, K), 0, N, dtype=jnp.int32)

    # Deterministic parameter init (stored as (in, out), i.e. PyTorch weight.T)
    params = []
    pkeys = jax.random.split(k_p, len(layers) - 1)
    for i in range(len(layers) - 1):
        fan_in, fan_out = layers[i], layers[i + 1]
        kw, kb = jax.random.split(pkeys[i])
        bound = 1.0 / (fan_in ** 0.5)
        w = jax.random.uniform(kw, (fan_in, fan_out), jnp.float32, -bound, bound)
        b = jax.random.uniform(kb, (fan_out,), jnp.float32, -bound, bound)
        params.append((w, b))

    for mode in ("Maxmin", "Avg"):
        out = decoder_forward(v_feat, hedge_idx, params, mode)
        out = jax.block_until_ready(out)
        ref = _reference(v_feat, hedge_idx, params, mode)
        assert out.shape == (H, layers[-1]), (mode, out.shape)
        # Tolerance covers MXU f32 pass-count differences vs. the HIGHEST-precision
        # XLA reference; a functional bug would differ at O(1e-1).
        assert jnp.allclose(out, ref, atol=2e-3), f"mismatch in {mode}"

    print("KERNEL_OK")
</pallas_src>

<mosaic_0001>
module attributes {stable_mosaic.version = 11 : i64} {
  func.func @_decoder_kernel(%arg0: i32, %arg1: memref<24x4xi32, #tpu.memory_space<vmem>>, %arg2: memref<16x32xf32, #tpu.memory_space<vmem>>, %arg3: memref<32x64xf32, #tpu.memory_space<vmem>>, %arg4: memref<1x64xf32, #tpu.memory_space<vmem>>, %arg5: memref<64x16xf32, #tpu.memory_space<vmem>>, %arg6: memref<1x16xf32, #tpu.memory_space<vmem>>, %arg7: memref<16x8xf32, #tpu.memory_space<vmem>>, %arg8: memref<1x8xf32, #tpu.memory_space<vmem>>, %arg9: memref<24x8xf32, #tpu.memory_space<vmem>>) attributes {dimension_semantics = [#tpu.dimension_semantics<parallel>], iteration_bounds = array<i64: 1>, scalar_prefetch = 0 : i64, scratch_operands = 0 : i64, tpu.core_type = #tpu.core_type<tc>, window_params = [{transform_indices = @transform_0, window_bounds = array<i64: 24, 4>}, {pipeline_mode = #tpu.pipeline_mode<synchronous>, transform_indices = @transform_1, window_bounds = array<i64: 16, 32>}, {pipeline_mode = #tpu.pipeline_mode<synchronous>, transform_indices = @transform_2, window_bounds = array<i64: 32, 64>}, {pipeline_mode = #tpu.pipeline_mode<synchronous>, transform_indices = @transform_3, window_bounds = array<i64: 1, 64>}, {pipeline_mode = #tpu.pipeline_mode<synchronous>, transform_indices = @transform_4, window_bounds = array<i64: 64, 16>}, {pipeline_mode = #tpu.pipeline_mode<synchronous>, transform_indices = @transform_5, window_bounds = array<i64: 1, 16>}, {pipeline_mode = #tpu.pipeline_mode<synchronous>, transform_indices = @transform_6, window_bounds = array<i64: 16, 8>}, {pipeline_mode = #tpu.pipeline_mode<synchronous>, transform_indices = @transform_7, window_bounds = array<i64: 1, 8>}, {transform_indices = @transform_8, window_bounds = array<i64: 24, 8>}]} {
    %c0 = arith.constant 0 : index
    %c0_0 = arith.constant 0 : index
    %0 = vector.load %arg2[%c0, %c0_0] : memref<16x32xf32, #tpu.memory_space<vmem>>, vector<16x32xf32>
    %c0_1 = arith.constant 0 : index
    %c0_2 = arith.constant 0 : index
    %1 = vector.load %arg1[%c0_1, %c0_2] : memref<24x4xi32, #tpu.memory_space<vmem>>, vector<24x4xi32>
    %2 = tpu.iota {dimensions = array<i32: 1>} : vector<24x16xi32>
    %3 = vector.extract_strided_slice %1 {offsets = [0, 0], sizes = [24, 1], strides = [1, 1]} : vector<24x4xi32> to vector<24x1xi32>
    %4 = vector.broadcast %3 : vector<24x1xi32> to vector<24x16xi32>
    %5 = arith.cmpi eq, %4, %2 : vector<24x16xi32>
    %6 = arith.extui %5 : vector<24x16xi1> to vector<24x16xi32>
    %7 = arith.sitofp %6 : vector<24x16xi32> to vector<24x16xf32>
    %cst = arith.constant dense<0.000000e+00> : vector<24x32xf32>
    %8 = tpu.matmul %7, %0, %cst {dimension_numbers = #tpu.dot_dimension_numbers<[1], [0], [0], [1], [0, 0, 1, 1], [], []>} : vector<24x16xf32>, vector<16x32xf32>, vector<24x32xf32> -> vector<24x32xf32>
    %9 = vector.extract_strided_slice %1 {offsets = [0, 1], sizes = [24, 1], strides = [1, 1]} : vector<24x4xi32> to vector<24x1xi32>
    %10 = vector.broadcast %9 : vector<24x1xi32> to vector<24x16xi32>
    %11 = arith.cmpi eq, %10, %2 : vector<24x16xi32>
    %12 = arith.extui %11 : vector<24x16xi1> to vector<24x16xi32>
    %13 = arith.sitofp %12 : vector<24x16xi32> to vector<24x16xf32>
    %cst_3 = arith.constant dense<0.000000e+00> : vector<24x32xf32>
    %14 = tpu.matmul %13, %0, %cst_3 {dimension_numbers = #tpu.dot_dimension_numbers<[1], [0], [0], [1], [0, 0, 1, 1], [], []>} : vector<24x16xf32>, vector<16x32xf32>, vector<24x32xf32> -> vector<24x32xf32>
    %15 = arith.maximumf %8, %14 : vector<24x32xf32>
    %16 = arith.minimumf %8, %14 : vector<24x32xf32>
    %17 = vector.extract_strided_slice %1 {offsets = [0, 2], sizes = [24, 1], strides = [1, 1]} : vector<24x4xi32> to vector<24x1xi32>
    %18 = vector.broadcast %17 : vector<24x1xi32> to vector<24x16xi32>
    %19 = arith.cmpi eq, %18, %2 : vector<24x16xi32>
    %20 = arith.extui %19 : vector<24x16xi1> to vector<24x16xi32>
    %21 = arith.sitofp %20 : vector<24x16xi32> to vector<24x16xf32>
    %cst_4 = arith.constant dense<0.000000e+00> : vector<24x32xf32>
    %22 = tpu.matmul %21, %0, %cst_4 {dimension_numbers = #tpu.dot_dimension_numbers<[1], [0], [0], [1], [0, 0, 1, 1], [], []>} : vector<24x16xf32>, vector<16x32xf32>, vector<24x32xf32> -> vector<24x32xf32>
    %23 = arith.maximumf %15, %22 : vector<24x32xf32>
    %24 = arith.minimumf %16, %22 : vector<24x32xf32>
    %25 = vector.extract_strided_slice %1 {offsets = [0, 3], sizes = [24, 1], strides = [1, 1]} : vector<24x4xi32> to vector<24x1xi32>
    %26 = vector.broadcast %25 : vector<24x1xi32> to vector<24x16xi32>
    %27 = arith.cmpi eq, %26, %2 : vector<24x16xi32>
    %28 = arith.extui %27 : vector<24x16xi1> to vector<24x16xi32>
    %29 = arith.sitofp %28 : vector<24x16xi32> to vector<24x16xf32>
    %cst_5 = arith.constant dense<0.000000e+00> : vector<24x32xf32>
    %30 = tpu.matmul %29, %0, %cst_5 {dimension_numbers = #tpu.dot_dimension_numbers<[1], [0], [0], [1], [0, 0, 1, 1], [], []>} : vector<24x16xf32>, vector<16x32xf32>, vector<24x32xf32> -> vector<24x32xf32>
    %31 = arith.maximumf %23, %30 : vector<24x32xf32>
    %32 = arith.minimumf %24, %30 : vector<24x32xf32>
    %33 = arith.subf %31, %32 : vector<24x32xf32>
    %c0_6 = arith.constant 0 : index
    %c0_7 = arith.constant 0 : index
    %34 = vector.load %arg3[%c0_6, %c0_7] : memref<32x64xf32, #tpu.memory_space<vmem>>, vector<32x64xf32>
    %c0_8 = arith.constant 0 : index
    %c0_9 = arith.constant 0 : index
    %35 = vector.load %arg4[%c0_8, %c0_9] : memref<1x64xf32, #tpu.memory_space<vmem>>, vector<1x64xf32>
    %cst_10 = arith.constant dense<0.000000e+00> : vector<24x64xf32>
    %36 = tpu.matmul %33, %34, %cst_10 {dimension_numbers = #tpu.dot_dimension_numbers<[1], [0], [0], [1], [0, 0, 1, 1], [], []>} : vector<24x32xf32>, vector<32x64xf32>, vector<24x64xf32> -> vector<24x64xf32>
    %37 = vector.broadcast %35 : vector<1x64xf32> to vector<24x64xf32>
    %38 = arith.addf %36, %37 : vector<24x64xf32>
    %cst_11 = arith.constant 0.000000e+00 : f32
    %39 = vector.broadcast %cst_11 : f32 to vector<24x64xf32>
    %40 = arith.maximumf %38, %39 : vector<24x64xf32>
    %c0_12 = arith.constant 0 : index
    %c0_13 = arith.constant 0 : index
    %41 = vector.load %arg5[%c0_12, %c0_13] : memref<64x16xf32, #tpu.memory_space<vmem>>, vector<64x16xf32>
    %c0_14 = arith.constant 0 : index
    %c0_15 = arith.constant 0 : index
    %42 = vector.load %arg6[%c0_14, %c0_15] : memref<1x16xf32, #tpu.memory_space<vmem>>, vector<1x16xf32>
    %cst_16 = arith.constant dense<0.000000e+00> : vector<24x16xf32>
    %43 = tpu.matmul %40, %41, %cst_16 {dimension_numbers = #tpu.dot_dimension_numbers<[1], [0], [0], [1], [0, 0, 1, 1], [], []>} : vector<24x64xf32>, vector<64x16xf32>, vector<24x16xf32> -> vector<24x16xf32>
    %44 = vector.broadcast %42 : vector<1x16xf32> to vector<24x16xf32>
    %45 = arith.addf %43, %44 : vector<24x16xf32>
    %cst_17 = arith.constant 0.000000e+00 : f32
    %46 = vector.broadcast %cst_17 : f32 to vector<24x16xf32>
    %47 = arith.maximumf %45, %46 : vector<24x16xf32>
    %c0_18 = arith.constant 0 : index
    %c0_19 = arith.constant 0 : index
    %48 = vector.load %arg7[%c0_18, %c0_19] : memref<16x8xf32, #tpu.memory_space<vmem>>, vector<16x8xf32>
    %c0_20 = arith.constant 0 : index
    %c0_21 = arith.constant 0 : index
    %49 = vector.load %arg8[%c0_20, %c0_21] : memref<1x8xf32, #tpu.memory_space<vmem>>, vector<1x8xf32>
    %cst_22 = arith.constant dense<0.000000e+00> : vector<24x8xf32>
    %50 = tpu.matmul %47, %48, %cst_22 {dimension_numbers = #tpu.dot_dimension_numbers<[1], [0], [0], [1], [0, 0, 1, 1], [], []>} : vector<24x16xf32>, vector<16x8xf32>, vector<24x8xf32> -> vector<24x8xf32>
    %51 = vector.broadcast %49 : vector<1x8xf32> to vector<24x8xf32>
    %52 = arith.addf %50, %51 : vector<24x8xf32>
    %53 = arith.negf %52 : vector<24x8xf32>
    %54 = math.exp %53 : vector<24x8xf32>
    %cst_23 = arith.constant 1.000000e+00 : f32
    %55 = vector.broadcast %cst_23 : f32 to vector<24x8xf32>
    %56 = arith.addf %55, %54 : vector<24x8xf32>
    %57 = arith.divf %55, %56 : vector<24x8xf32>
    %c0_24 = arith.constant 0 : index
    %c0_25 = arith.constant 0 : index
    %58 = vector.load %arg9[%c0_24, %c0_25] : memref<24x8xf32, #tpu.memory_space<vmem>>, vector<24x8xf32>
    tpu.vector_store %arg9[%c0_24, %c0_25], %57 {strides = array<i32>} : memref<24x8xf32, #tpu.memory_space<vmem>>, vector<24x8xf32>,
    return
  }
  func.func @transform_0(%arg0: i32) -> (i32, i32) {
    %c0_i32 = arith.constant 0 : i32
    %c0_i32_0 = arith.constant 0 : i32
    return %arg0, %c0_i32 : i32, i32
  }
  func.func @transform_1(%arg0: i32) -> (i32, i32) {
    %c0_i32 = arith.constant 0 : i32
    %c0_i32_0 = arith.constant 0 : i32
    %c0_i32_1 = arith.constant 0 : i32
    return %c0_i32, %c0_i32_0 : i32, i32
  }
  func.func @transform_2(%arg0: i32) -> (i32, i32) {
    %c0_i32 = arith.constant 0 : i32
    %c0_i32_0 = arith.constant 0 : i32
    %c0_i32_1 = arith.constant 0 : i32
    return %c0_i32, %c0_i32_0 : i32, i32
  }
  func.func @transform_3(%arg0: i32) -> (i32, i32) {
    %c0_i32 = arith.constant 0 : i32
    %c0_i32_0 = arith.constant 0 : i32
    %c0_i32_1 = arith.constant 0 : i32
    return %c0_i32, %c0_i32_0 : i32, i32
  }
  func.func @transform_4(%arg0: i32) -> (i32, i32) {
    %c0_i32 = arith.constant 0 : i32
    %c0_i32_0 = arith.constant 0 : i32
    %c0_i32_1 = arith.constant 0 : i32
    return %c0_i32, %c0_i32_0 : i32, i32
  }
  func.func @transform_5(%arg0: i32) -> (i32, i32) {
    %c0_i32 = arith.constant 0 : i32
    %c0_i32_0 = arith.constant 0 : i32
    %c0_i32_1 = arith.constant 0 : i32
    return %c0_i32, %c0_i32_0 : i32, i32
  }
  func.func @transform_6(%arg0: i32) -> (i32, i32) {
    %c0_i32 = arith.constant 0 : i32
    %c0_i32_0 = arith.constant 0 : i32
    %c0_i32_1 = arith.constant 0 : i32
    return %c0_i32, %c0_i32_0 : i32, i32
  }
  func.func @transform_7(%arg0: i32) -> (i32, i32) {
    %c0_i32 = arith.constant 0 : i32
    %c0_i32_0 = arith.constant 0 : i32
    %c0_i32_1 = arith.constant 0 : i32
    return %c0_i32, %c0_i32_0 : i32, i32
  }
  func.func @transform_8(%arg0: i32) -> (i32, i32) {
    %c0_i32 = arith.constant 0 : i32
    %c0_i32_0 = arith.constant 0 : i32
    return %arg0, %c0_i32 : i32, i32
  }
}

</mosaic_0001>

<bundles_post_ra>
// kernel: tpu_custom_call.1
= control target key start
LH: loop header
LB: loop body
LE: loop exit
PB: predicated region body
PF: predicated region fallthrough
CT: control target
= control target key end

     0   :  { %v1075_v0 = vmov 0   ;;  %v1076_v5 = vmov 0.0|0.0   ;;  %vm1077_vm0 = vmmov 0   ;;  %v1078_v8 = vmov 0.0   ;;  %s1300_s0 = inlined_call_operand.vmem [shape: s32[24,4], index: 0, kind: input, shape index: {}]   ;;  %s1301_s1 = inlined_call_operand.vmem [shape: f32[16,32], index: 1, kind: input, shape index: {}]   ;;  %s1302_s2 = inlined_call_operand.vmem [shape: f32[32,64], index: 2, kind: input, shape index: {}]   ;;  %s1303_s4 = inlined_call_operand.vmem [shape: f32[64,16], index: 4, kind: input, shape index: {}]   ;;  %s1304_s6 = inlined_call_operand.vmem [shape: f32[16,8], index: 6, kind: input, shape index: {}]   ;;  %s1305_s3 = inlined_call_operand.vmem [shape: f32[1,64], index: 3, kind: input, shape index: {}]   ;;  %s1306_s5 = inlined_call_operand.vmem [shape: f32[1,16], index: 5, kind: input, shape index: {}]   ;;  %s1307_s7 = inlined_call_operand.vmem [shape: f32[1,8], index: 7, kind: input, shape index: {}]   ;;  %s1308_s8 = inlined_call_operand.vmem [shape: f32[24,8], index: 8, kind: output, shape index: {}]  }
   0x1   :  { %1055 = vset.pattern.permute.xlu1 %v1075_v0  ;;  %1053 = vset.pattern.permute.xlu0 %v1075_v0  ;;  %v33_v1 = vld [vmem:[%s1300_s0 + $0x10] sm:$0xff]  ;;  %v31_v2 = vld [vmem:[%s1300_s0] sm:$0xff]  ;;  %v30_v4 = vld [vmem:[%s1301_s1 + $0x8] sm:$0xff]  ;;  %v1079_v9 = vmov 1   ;;  %v1080_v10 = vmov 3   ;;  %v1081_v11 = vmov 2   ;;  %v34_v12 = vlaneseq }
   0x2   :  { %43 = vperm.xlu0 %1053, %v33_v1   ;;  %37 = vperm.xlu1 %1055, %v31_v2   ;;  %v29_v3 = vld [vmem:[%s1301_s1] sm:$0xff]  ;;  %v32_v7 = vld [vmem:[%s1300_s0 + $0x8] sm:$0xff]  ;;  %vm54_vm1 = vcmask 130048   ;;  %v488_v41 = vld [vmem:[%s1302_s2 + $0x10] sm:$0xff]  ;;  %vm497_vm14 = vcmask 261120   ;;  %vm605_vm15 = vcmask 523264  }
   0x3   :  { %1011 = vmatprep.subr.bf16.mxu0 %v1076_v5  ;;  %1044 = vmatprep.subr.bf16.mxu1 %v1076_v5  ;;  %v1012_v6 = vpack.c.bf16 %v30_v4, %v29_v3  ;;  %v1150_v13 = vand.u32 127, %v34_v12  ;;  %v486_v38 = vld [vmem:[%s1302_s2] sm:$0xff]  ;;  %v487_v39 = vld [vmem:[%s1302_s2 + $0x8] sm:$0xff]  ;;  %v489_v42 = vld [vmem:[%s1302_s2 + $0x18] sm:$0xff] }
   0x4   :  { %908 = vmatprep.mubr.msk.f32.mxu0 %vm1077_vm0, %v1078_v8  ;;  %914 = vmatprep.mubr.msk.f32.mxu1 %vm1077_vm0, %v1078_v8  ;;  %v1024_v40 = vpack.c.bf16 %v487_v39, %v486_v38  ;;  %v1027_v43 = vpack.c.bf16 %v489_v42, %v488_v41  ;;  %v590_v44 = vld [vmem:[%s1303_s4] sm:$0xff]  ;;  %v591_v45 = vld [vmem:[%s1303_s4 + $0x8] sm:$0xff]  ;;  %v592_v46 = vld [vmem:[%s1303_s4 + $0x10] sm:$0xff] }
   0x5   :  { %1013 = vmatpush3.bf16.msra.mxu0 %v1012_v6  ;;  %1045 = vmatpush3.bf16.msra.mxu1 %v1012_v6  ;;  %v1030_v47 = vpack.c.bf16 %v591_v45, %v590_v44  ;;  %v593_v48 = vld [vmem:[%s1303_s4 + $0x18] sm:$0xff]  ;;  %v594_v50 = vld [vmem:[%s1303_s4 + $0x20] sm:$0xff]  ;;  %v595_v51 = vld [vmem:[%s1303_s4 + $0x28] sm:$0xff] }
   0x6   :  { %1054 = vset.pattern.permute.xlu0 %v1079_v9  ;;  %1056 = vset.pattern.permute.xlu1 %v1079_v9  ;;  %v1033_v49 = vpack.c.bf16 %v593_v48, %v592_v46  ;;  %v1036_v52 = vpack.c.bf16 %v595_v51, %v594_v50  ;;  %v698_v38 = vld [vmem:[%s1304_s6] sm:$0xff]  ;;  %v699_v39 = vld [vmem:[%s1304_s6 + $0x8] sm:$0xff] }
   0x7   :  { %148 = vperm.xlu1 %1056, %v32_v7   ;;  %145 = vperm.xlu0 %1054, %v31_v2   ;;  %v846_v41 = vld [vmem:[%s1305_s3] ss:$0 sm:$0xff] }
   0x8   :  { %1014 = vmatprep.subr.bf16.mxu1 %v1076_v5  ;;  %1017 = vmatprep.subr.bf16.mxu0 %v1076_v5 }
   0xb   :  { %1057 = vset.pattern.permute.xlu1 %v1075_v0  ;;  %151 = vperm.xlu0 %1054, %v33_v1  }
   0xc   :  { %40 = vperm.xlu1 %1057, %v32_v7  }
   0xf   :  { %1059 = vset.pattern.permute.xlu0 %v1080_v10 }
  0x10   :  { %1058 = vset.pattern.permute.xlu1 %v1081_v11  ;;  %371 = vperm.xlu0 %1059, %v31_v2  }
  0x11   :  { %258 = vperm.xlu1 %1058, %v31_v2  }
  0x14   :  { %1061 = vset.pattern.permute.xlu0 %v1081_v11 }
  0x15   :  { %261 = vperm.xlu1 %1058, %v32_v7   ;;  %264 = vperm.xlu0 %1061, %v33_v1  }
  0x19   :  { %1060 = vset.pattern.permute.xlu1 %v1080_v10  ;;  %1062 = vset.pattern.permute.xlu0 %v1080_v10 }
  0x1a   :  { %374 = vperm.xlu1 %1060, %v32_v7  }
  0x1e   :  { %377 = vperm.xlu1 %1060, %v33_v1  }
  0x81   :  { %v38_v14 = vpop.permute.xlu1 %37  ;;  %v44_v15 = vpop.permute.xlu0 %43 }
  0x82   :  { %vm45_vm2 = vcmp.eq.s32.totalorder %v38_v14, %v1150_v13  ;;  %vm47_vm3 = vcmp.eq.s32.totalorder %v44_v15, %v1150_v13 }
  0x83   :  { %v822_v16 = vsel %vm45_vm2, 1.0, %v1078_v8  ;;  %v824_v17 = vsel %vm47_vm3, 1.0, %v1078_v8 }
  0x84   :  { %909 = vmatmul.mubr.msk.f32.vlgmr.msra.gmra.mrb[0].mxu0 %vm54_vm1, %v822_v16  ;;  %915 = vmatmul.mubr.msk.f32.vlgmr.msra.gmra.mrb[0].mxu1 %vm54_vm1, %v824_v17 }
  0x85   :  { %1016 = vmatpush3.bf16.msra.mxu1 %v1012_v6  ;;  %921 = vmatprep.mubr.msk.f32.mxu1 %vm1077_vm0, %v1078_v8 }
  0x86   :  { %v149_v18 = vpop.permute.xlu1 %148  ;;  %v146_v19 = vpop.permute.xlu0 %145  ;;  %1020 = vmatprep.subr.bf16.mxu1 %v1076_v5  ;;  %911 = vmatprep.mubr.msk.f32.mxu0 %vm1077_vm0, %v1078_v8 }
  0x87   :  { %vm153_vm4 = vcmp.eq.s32.totalorder %v146_v19, %v1150_v13  ;;  %1019 = vmatpush3.bf16.msra.mxu0 %v1012_v6  ;;  %vm154_vm5 = vcmp.eq.s32.totalorder %v149_v18, %v1150_v13 }
  0x88   :  { %v828_v20 = vsel %vm153_vm4, 1.0, %v1078_v8  ;;  %1023 = vmatprep.subr.bf16.mxu0 %v1076_v5  ;;  %v829_v23 = vsel %vm154_vm5, 1.0, %v1078_v8 }
  0x89   :  { %922 = vmatmul.mubr.msk.f32.vlgmr.msra.gmra.mrb[2].mxu1 %vm54_vm1, %v828_v20 }
  0x8a   :  { %v152_v21 = vpop.permute.xlu0 %151  ;;  %924 = vmatprep.mubr.msk.f32.mxu1 %vm1077_vm0, %v1078_v8  ;;  %1022 = vmatpush3.bf16.msra.mxu1 %v1012_v6 }
  0x8b   :  { %v41_v22 = vpop.permute.xlu1 %40  ;;  %1029 = vmatprep.subr.bf16.mxu1 %v1076_v5  ;;  %vm155_vm7 = vcmp.eq.s32.totalorder %v152_v21, %v1150_v13 }
  0x8c   :  { %vm46_vm6 = vcmp.eq.s32.totalorder %v41_v22, %v1150_v13  ;;  %v830_v26 = vsel %vm155_vm7, 1.0, %v1078_v8 }
  0x8d   :  { %v823_v24 = vsel %vm46_vm6, 1.0, %v1078_v8  ;;  %925 = vmatmul.mubr.msk.f32.gmra.mrb[4].mxu1 %vm54_vm1, %v829_v23 }
  0x8e   :  { %912 = vmatmul.mubr.msk.f32.gmra.mrb[2].mxu0 %vm54_vm1, %v823_v24  ;;  %927 = vmatprep.mubr.msk.f32.mxu1 %vm1077_vm0, %v1078_v8 }
  0x8f   :  { %934 = vmatprep.mubr.msk.f32.mxu0 %vm1077_vm0, %v1078_v8  ;;  %v372_v25 = vpop.permute.xlu0 %371 }
  0x90   :  { %v259_v27 = vpop.permute.xlu1 %258  ;;  %vm379_vm8 = vcmp.eq.s32.totalorder %v372_v25, %v1150_v13 }
  0x91   :  { %vm266_vm9 = vcmp.eq.s32.totalorder %v259_v27, %v1150_v13  ;;  %928 = vmatmul.mubr.msk.f32.gmra.mrb[6].mxu1 %vm54_vm1, %v830_v26  ;;  %v840_v29 = vsel %vm379_vm8, 1.0, %v1078_v8 }
  0x92   :  { %v834_v28 = vsel %vm266_vm9, 1.0, %v1078_v8  ;;  %947 = vmatprep.mubr.msk.f32.mxu1 %vm1077_vm0, %v1078_v8 }
  0x93   :  { %935 = vmatmul.mubr.msk.f32.vlgmr.msra.gmra.mrb[4].mxu0 %vm54_vm1, %v834_v28 }
  0x94   :  { %v262_v30 = vpop.permute.xlu1 %261  ;;  %937 = vmatprep.mubr.msk.f32.mxu0 %vm1077_vm0, %v1078_v8  ;;  %v265_v31 = vpop.permute.xlu0 %264  ;;  %1025 = vmatpush3.bf16.msra.mxu0 %v1024_v40  ;;  %v1042_v40 = vpack.c.bf16 %v699_v39, %v698_v38 }
  0x95   :  { %vm267_vm10 = vcmp.eq.s32.totalorder %v262_v30, %v1150_v13  ;;  %948 = vmatmul.mubr.msk.f32.vlgmr.msra.gmra.mrb[8].mxu1 %vm54_vm1, %v840_v29  ;;  %vm268_vm11 = vcmp.eq.s32.totalorder %v265_v31, %v1150_v13  ;;  %1026 = vmatprep.subr.bf16.mxu0 %v1076_v5 }
  0x96   :  { %v835_v32 = vsel %vm267_vm10, 1.0, %v1078_v8  ;;  %950 = vmatprep.mubr.msk.f32.mxu1 %vm1077_vm0, %v1078_v8  ;;  %v836_v33 = vsel %vm268_vm11, 1.0, %v1078_v8  ;;  %1031 = vmatpush3.bf16.msra.mxu1 %v1030_v47 }
  0x97   :  { %938 = vmatmul.mubr.msk.f32.gmra.mrb[6].mxu0 %vm54_vm1, %v835_v32  ;;  %1032 = vmatprep.subr.bf16.mxu1 %v1076_v5 }
  0x98   :  { %940 = vmatprep.mubr.msk.f32.mxu0 %vm1077_vm0, %v1078_v8  ;;  %1028 = vmatpush3.bf16.msra.mxu0 %v1027_v43 }
  0x99   :  { %v375_v34 = vpop.permute.xlu1 %374  ;;  %1041 = vmatprep.subr.bf16.mxu0 %v1076_v5 }
  0x9a   :  { %vm380_vm12 = vcmp.eq.s32.totalorder %v375_v34, %v1150_v13  ;;  %1034 = vmatpush3.bf16.msra.mxu1 %v1033_v49 }
  0x9b   :  { %v841_v35 = vsel %vm380_vm12, 1.0, %v1078_v8  ;;  %941 = vmatmul.mubr.msk.f32.gmra.mrb[8].mxu0 %vm54_vm1, %v836_v33  ;;  %1035 = vmatprep.subr.bf16.mxu1 %v1076_v5 }
  0x9c   :  { %951 = vmatmul.mubr.msk.f32.gmra.mrb[10].mxu1 %vm54_vm1, %v841_v35  ;;  %964 = vmatprep.mubr.msk.f32.mxu0 %vm1077_vm0, %v1078_v8  ;;  %v596_v35 = vld [vmem:[%s1303_s4 + $0x30] sm:$0xff] }
  0x9d   :  { %v378_v36 = vpop.permute.xlu1 %377  ;;  %953 = vmatprep.mubr.msk.f32.mxu1 %vm1077_vm0, %v1078_v8 }
  0x9e   :  { %vm381_vm13 = vcmp.eq.s32.totalorder %v378_v36, %v1150_v13  ;;  %1037 = vmatpush3.bf16.msra.mxu1 %v1036_v52  ;;  %v597_v36 = vld [vmem:[%s1303_s4 + $0x38] sm:$0xff] }
  0x9f   :  { %v842_v37 = vsel %vm381_vm13, 1.0, %v1078_v8  ;;  %1038 = vmatprep.subr.bf16.mxu1 %v1076_v5 }
  0xa0   :  { %954 = vmatmul.mubr.msk.f32.gmra.mrb[12].mxu1 %vm54_vm1, %v842_v37  ;;  %v1039_v37 = vpack.c.bf16 %v597_v36, %v596_v35 }
  0xa1   :  { %989 = vmatprep.mubr.msk.f32.mxu1 %vm1077_vm0, %v1078_v8 }
  0xa2   :  { %1040 = vmatpush3.bf16.msra.mxu1 %v1039_v37 }
 0x157   :  { %v130_v53 = vpop.f32.mrb[0].mxu0  ;;  %v140_v54 = vpop.f32.mrb[0].mxu1 }
 0x158   :  { %v910_v55 = vpop.f32.mrb[1].mxu0  ;;  %v916_v56 = vpop.f32.mrb[1].mxu1 }
 0x15c   :  { %v237_v57 = vpop.f32.mrb[2].mxu1 }
 0x15d   :  { %v251_v58 = vmax.f32 %v130_v53, %v237_v57  ;;  %v254_v59 = vmin.f32 %v130_v53, %v237_v57  ;;  %v923_v60 = vpop.f32.mrb[3].mxu1 }
 0x160   :  { %v242_v61 = vpop.f32.mrb[4].mxu1 }
 0x161   :  { %v135_v62 = vpop.f32.mrb[2].mxu0  ;;  %v926_v63 = vpop.f32.mrb[5].mxu1 }
 0x162   :  { %v252_v0 = vmax.f32 %v135_v62, %v242_v61  ;;  %v255_v1 = vmin.f32 %v135_v62, %v242_v61  ;;  %v913_v2 = vpop.f32.mrb[3].mxu0 }
 0x164   :  { %v247_v3 = vpop.f32.mrb[6].mxu1 }
 0x165   :  { %v253_v4 = vmax.f32 %v140_v54, %v247_v3  ;;  %v256_v6 = vmin.f32 %v140_v54, %v247_v3  ;;  %v929_v7 = vpop.f32.mrb[7].mxu1  ;;  %v850_v54 = vld [vmem:[%s1306_s5] ss:$0 sm:$0xff] }
 0x166   :  { %v350_v9 = vpop.f32.mrb[4].mxu0  ;;  %v854_v3 = vld [vmem:[%s1307_s7] ss:$0 sm:$0xff] }
 0x167   :  { %v364_v5 = vmax.f32 %v251_v58, %v350_v9  ;;  %v367_v10 = vmin.f32 %v254_v59, %v350_v9  ;;  %v936_v11 = vpop.f32.mrb[5].mxu0 }
 0x168   :  { %v463_v12 = vpop.f32.mrb[8].mxu1 }
 0x169   :  { %v477_v13 = vmax.f32 %v364_v5, %v463_v12  ;;  %v480_v14 = vmin.f32 %v367_v10, %v463_v12  ;;  %v949_v15 = vpop.f32.mrb[9].mxu1 }
 0x16a   :  { %v355_v16 = vpop.f32.mrb[6].mxu0 }
 0x16b   :  { %v483_v17 = vsub.f32 %v477_v13, %v480_v14  ;;  %v365_v18 = vmax.f32 %v252_v0, %v355_v16  ;;  %v368_v19 = vmin.f32 %v255_v1, %v355_v16  ;;  %v939_v20 = vpop.f32.mrb[7].mxu0 }
 0x16d   :  { %965 = vmatmul.mubr.msk.f32.vlgmr.msra.gmra.mrb[10].mxu0 %vm497_vm14, %v483_v17 }
 0x16e   :  { %v360_v21 = vpop.f32.mrb[8].mxu0  ;;  %967 = vmatprep.mubr.msk.f32.mxu0 %vm1077_vm0, %v1078_v8  ;;  %1043 = vmatpush3.bf16.msra.mxu0 %v1042_v40 }
 0x16f   :  { %v366_v22 = vmax.f32 %v253_v4, %v360_v21  ;;  %v369_v23 = vmin.f32 %v256_v6, %v360_v21  ;;  %v468_v24 = vpop.f32.mrb[10].mxu1  ;;  %v942_v25 = vpop.f32.mrb[9].mxu0 }
 0x170   :  { %v478_v26 = vmax.f32 %v365_v18, %v468_v24  ;;  %v481_v27 = vmin.f32 %v368_v19, %v468_v24  ;;  %v952_v28 = vpop.f32.mrb[11].mxu1 }
 0x172   :  { %v484_v29 = vsub.f32 %v478_v26, %v481_v27 }
 0x173   :  { %v473_v30 = vpop.f32.mrb[12].mxu1 }
 0x174   :  { %v479_v31 = vmax.f32 %v366_v22, %v473_v30  ;;  %v482_v32 = vmin.f32 %v369_v23, %v473_v30  ;;  %v955_v33 = vpop.f32.mrb[13].mxu1  ;;  %968 = vmatmul.mubr.msk.f32.gmra.mrb[12].mxu0 %vm497_vm14, %v484_v29 }
 0x175   :  { %970 = vmatprep.mubr.msk.f32.mxu0 %vm1077_vm0, %v1078_v8 }
 0x176   :  { %v485_v34 = vsub.f32 %v479_v31, %v482_v32 }
 0x178   :  { %971 = vmatmul.mubr.msk.f32.gmra.mrb[14].mxu0 %vm497_vm14, %v485_v34 }
 0x179   :  { %1002 = vmatprep.mubr.msk.f32.mxu0 %vm1077_vm0, %v1078_v8 }
 0x240   :  { %v573_v42 = vpop.f32.mrb[10].mxu0 }
 0x241   :  { %v574_v43 = vadd.f32 %v846_v41, %v573_v42  ;;  %v966_v44 = vpop.f32.mrb[11].mxu0 }
 0x243   :  { %v587_v45 = vmax.f32 %v574_v43, 0.0 }
 0x245   :  { %990 = vmatmul.mubr.msk.f32.vlgmr.msra.gmra.mrb[14].mxu1 %vm605_vm15, %v587_v45 }
 0x246   :  { %992 = vmatprep.mubr.msk.f32.mxu1 %vm1077_vm0, %v1078_v8 }
 0x247   :  { %v578_v46 = vpop.f32.mrb[12].mxu0 }
 0x248   :  { %v579_v47 = vadd.f32 %v846_v41, %v578_v46  ;;  %v969_v48 = vpop.f32.mrb[13].mxu0 }
 0x24a   :  { %v588_v49 = vmax.f32 %v579_v47, 0.0 }
 0x24b   :  { %v583_v50 = vpop.f32.mrb[14].mxu0 }
 0x24c   :  { %v584_v51 = vadd.f32 %v846_v41, %v583_v50  ;;  %v972_v52 = vpop.f32.mrb[15].mxu0  ;;  %993 = vmatmul.mubr.msk.f32.gmra.mrb[16].mxu1 %vm605_vm15, %v588_v49 }
 0x24d   :  { %995 = vmatprep.mubr.msk.f32.mxu1 %vm1077_vm0, %v1078_v8 }
 0x24e   :  { %v589_v53 = vmax.f32 %v584_v51, 0.0 }
 0x250   :  { %996 = vmatmul.mubr.msk.f32.gmra.mrb[18].mxu1 %vm605_vm15, %v589_v53 }
 0x318   :  { %v681_v55 = vpop.f32.mrb[14].mxu1 }
 0x319   :  { %v682_v56 = vadd.f32 %v850_v54, %v681_v55  ;;  %v991_v57 = vpop.f32.mrb[15].mxu1 }
 0x31b   :  { %v695_v58 = vmax.f32 %v682_v56, 0.0 }
 0x31d   :  { %1003 = vmatmul.mubr.msk.f32.vlgmr.msra.gmra.mrb[16].mxu0 %vm54_vm1, %v695_v58 }
 0x31e   :  { %1005 = vmatprep.mubr.msk.f32.mxu0 %vm1077_vm0, %v1078_v8 }
 0x31f   :  { %v686_v59 = vpop.f32.mrb[16].mxu1 }
 0x320   :  { %v687_v60 = vadd.f32 %v850_v54, %v686_v59  ;;  %v994_v61 = vpop.f32.mrb[17].mxu1 }
 0x322   :  { %v696_v62 = vmax.f32 %v687_v60, 0.0 }
 0x323   :  { %v691_v63 = vpop.f32.mrb[18].mxu1 }
 0x324   :  { %v692_v0 = vadd.f32 %v850_v54, %v691_v63  ;;  %v997_v1 = vpop.f32.mrb[19].mxu1  ;;  %1006 = vmatmul.mubr.msk.f32.gmra.mrb[18].mxu0 %vm54_vm1, %v696_v62 }
 0x325   :  { %1008 = vmatprep.mubr.msk.f32.mxu0 %vm1077_vm0, %v1078_v8  ;;  %vm814_vm0 = vcmask 64512  }
 0x326   :  { %v697_v2 = vmax.f32 %v692_v0, 0.0 }
 0x328   :  { %1009 = vmatmul.mubr.msk.f32.gmra.mrb[20].mxu0 %vm54_vm1, %v697_v2 }
 0x3f0   :  { %v782_v4 = vpop.f32.mrb[16].mxu0 }
 0x3f1   :  { %v783_v6 = vadd.f32 %v854_v3, %v782_v4  ;;  %v1004_v7 = vpop.f32.mrb[17].mxu0 }
 0x3f3   :  { %v858_v9 = vmul.f32 -1.442695, %v783_v6 }
 0x3f5   :  { %1063 = vpow2.f32 %v858_v9 }
 0x3f7   :  { %v787_v5 = vpop.f32.mrb[18].mxu0 }
 0x3f8   :  { %v788_v10 = vadd.f32 %v854_v3, %v787_v5  ;;  %v1007_v11 = vpop.f32.mrb[19].mxu0 }
 0x3fa   :  { %v859_v12 = vmul.f32 -1.442695, %v788_v10 }
 0x3fb   :  { %v792_v13 = vpop.f32.mrb[20].mxu0 }
 0x3fc   :  { %1065 = vpow2.f32 %v859_v12  ;;  %v793_v14 = vadd.f32 %v854_v3, %v792_v13  ;;  %v1010_v8 = vpop.f32.mrb[21].mxu0 }
 0x3fe   :  { %v860_v15 = vmul.f32 -1.442695, %v793_v14 }
 0x3ff   :  { %v1064_v16 = vpop.eup %1063 }
 0x400   :  { %v805_v17 = vadd.f32 1.0, %v1064_v16  ;;  %1067 = vpow2.f32 %v860_v15 }
 0x402   :  { %1069 = vrcp.f32 %v805_v17 }
 0x406   :  { %v1066_v18 = vpop.eup %1065 }
 0x407   :  { %v806_v19 = vadd.f32 1.0, %v1066_v18 }
 0x409   :  { %1071 = vrcp.f32 %v806_v19 }
 0x40a   :  { %v1068_v20 = vpop.eup %1067 }
 0x40b   :  { %v807_v21 = vadd.f32 1.0, %v1068_v20 }
 0x40c   :  { %v1070_v22 = vpop.eup %1069 }
 0x40d   :  { %815 = vst.msk [vmem:[%s1308_s8] sm:$0xff] %vm814_vm0, %v1070_v22  ;;  %1073 = vrcp.f32 %v807_v21 }
 0x413   :  { %v1072_v23 = vpop.eup %1071 }
 0x414   :  { %816 = vst.msk [vmem:[%s1308_s8 + $0x8] sm:$0xff] %vm814_vm0, %v1072_v23 }
 0x417   :  { %v1074_v24 = vpop.eup %1073 }
 0x418   :  { %817 = vst.msk [vmem:[%s1308_s8 + $0x10] sm:$0xff] %vm814_vm0, %v1074_v24 }

</bundles_post_ra>
